<compile_context>
chip_gen: v6e
topology: v6e:2x2x1
jax: 0.10.0
libtpu: 0.0.40
codegen_flags: <defaults>
</compile_context>

<pallas_src>
import math
import functools

import jax
import jax.numpy as jnp
from jax.experimental import pallas as pl
from jax.experimental.pallas import tpu as pltpu


def _round_up(x, m):
    return ((x + m - 1) // m) * m


def _relu_linear_kernel(x_ref, w_ref, b_ref, o_ref):
    # K (input_dim) is the last grid axis; the output block index ignores k so
    # the f32 output tile stays resident in VMEM across the whole reduction --
    # accumulate into it directly (no separate scratch needed for f32 output).
    k = pl.program_id(2)

    @pl.when(k == 0)
    def _():
        o_ref[...] = jnp.zeros_like(o_ref)

    o_ref[...] += jnp.dot(
        x_ref[...], w_ref[...], preferred_element_type=jnp.float32
    )

    @pl.when(k == pl.num_programs(2) - 1)
    def _():
        o_ref[...] = jnp.maximum(o_ref[...] + b_ref[...], 0.0).astype(o_ref.dtype)


@functools.partial(
    jax.jit, static_argnames=("tm", "tn", "tk", "cast_inputs_to_bf16")
)
def relu_layer(x, w, b, *, tm=None, tn=None, tk=None, cast_inputs_to_bf16=False):
    """Computes relu(x @ w + b) with a single fused Pallas kernel.

    x: (M, K) float32
    w: (K, N) float32   (transpose of PyTorch's Linear.weight)
    b: (N,)   float32
    Returns: (M, N) float32
    """
    M, K = x.shape
    K2, N = w.shape
    assert K == K2 and b.shape == (N,)

    # ---- Tile defaults (budgeted for v7x's 64 MiB VMEM; fine on v5e/v6e) ----
    if tm is None:
        tm = M if M <= 256 else 256            # full extent if small, else mult of 8
    if tk is None:
        tk = K if K <= 2048 else 2048          # single K step when K is MLP-sized
    assert (tm % 8 == 0) or tm == M

    # ---- Pad N to a multiple of 128 for lane-dense output stores ----
    N_pad = _round_up(N, 128)
    if tn is None:
        tn = 256 if N_pad % 256 == 0 else 128
    assert (tn % 128 == 0) or tn == N_pad
    assert N_pad % tn == 0

    # ---- Pad K with zeros so no garbage enters the accumulation ----
    K_pad = _round_up(K, tk)
    assert (tk % 128 == 0) or tk == K_pad

    if K_pad != K:
        x = jnp.pad(x, ((0, 0), (0, K_pad - K)))
    if K_pad != K or N_pad != N:
        w = jnp.pad(w, ((0, K_pad - K), (0, N_pad - N)))
    if N_pad != N:
        b = jnp.pad(b, (0, N_pad - N))

    if cast_inputs_to_bf16:
        # Halves HBM traffic for x/w and unlocks the bf16 MXU rate; the
        # accumulation (o_ref, preferred_element_type) and bias stay f32.
        x = x.astype(jnp.bfloat16)
        w = w.astype(jnp.bfloat16)

    b2 = b.reshape(1, N_pad)

    grid = (pl.cdiv(M, tm), N_pad // tn, K_pad // tk)

    out = pl.pallas_call(
        _relu_linear_kernel,
        out_shape=jax.ShapeDtypeStruct((M, N_pad), jnp.float32),
        grid_spec=pltpu.PrefetchScalarGridSpec(
            num_scalar_prefetch=0,
            grid=grid,
            in_specs=[
                pl.BlockSpec((tm, tk), lambda i, j, k: (i, k)),
                pl.BlockSpec((tk, tn), lambda i, j, k: (k, j)),
                pl.BlockSpec((1, tn), lambda i, j, k: (0, j)),
            ],
            out_specs=pl.BlockSpec((tm, tn), lambda i, j, k: (i, j)),
        ),
        compiler_params=pltpu.CompilerParams(
            dimension_semantics=("parallel", "parallel", "arbitrary"),
            # Safe on every generation (v7x physical VMEM is 64 MiB).
            vmem_limit_bytes=48 * 1024 * 1024,
        ),
    )(x, w, b2)

    if N_pad != N:
        out = out[:, :N]
    return out


def init_relu_layer_params(key, input_dim, hidden_dim):
    """Deterministic init matching nn.Linear's default (kaiming-uniform-ish)."""
    kw, kb = jax.random.split(key)
    bound = 1.0 / math.sqrt(input_dim)
    # PyTorch stores weight as (hidden_dim, input_dim); we keep the transpose.
    w = jax.random.uniform(
        kw, (input_dim, hidden_dim), jnp.float32, minval=-bound, maxval=bound
    )
    b = jax.random.uniform(
        kb, (hidden_dim,), jnp.float32, minval=-bound, maxval=bound
    )
    return w, b


def _ref_relu_linear(x, w, b):
    return jnp.maximum(
        jnp.dot(x, w, precision=jax.lax.Precision.HIGHEST) + b, 0.0
    )


if __name__ == "__main__":
    key = jax.random.PRNGKey(0)
    k_x, k_p, k_x2, k_p2 = jax.random.split(key, 4)

    # Small shapes consistent with the module: (batch, input_dim) -> (batch, hidden_dim).
    batch, input_dim, hidden_dim = 8, 32, 64
    x = jax.random.normal(k_x, (batch, input_dim), jnp.float32)
    w, b = init_relu_layer_params(k_p, input_dim, hidden_dim)

    out = jax.block_until_ready(relu_layer(x, w, b))
    ref = _ref_relu_linear(x, w, b)
    assert out.shape == (batch, hidden_dim)
    assert jnp.allclose(out, ref, atol=1e-5, rtol=1e-5)

    # Exercise the tiled path: M remainder block, N padding to 128, K-axis
    # accumulation with zero-padded K tail.
    M2, Kdim2, N2 = 300, 2100, 192
    x2 = jax.random.normal(k_x2, (M2, Kdim2), jnp.float32)
    w2, b2 = init_relu_layer_params(k_p2, Kdim2, N2)
    out2 = jax.block_until_ready(relu_layer(x2, w2, b2))
    ref2 = _ref_relu_linear(x2, w2, b2)
    assert out2.shape == (M2, N2)
    assert jnp.allclose(out2, ref2, atol=1e-3, rtol=1e-3)

    # bf16-input path (f32 accumulation) -- looser tolerance.
    out_bf16 = jax.block_until_ready(relu_layer(x, w, b, cast_inputs_to_bf16=True))
    assert jnp.allclose(out_bf16, ref, atol=5e-2, rtol=5e-2)

    print("KERNEL_OK")
</pallas_src>

<mosaic_0001>
module attributes {stable_mosaic.version = 11 : i64} {
  func.func @_relu_linear_kernel(%arg0: i32, %arg1: i32, %arg2: i32, %arg3: memref<8x32xf32, #tpu.memory_space<vmem>>, %arg4: memref<32x128xf32, #tpu.memory_space<vmem>>, %arg5: memref<1x128xf32, #tpu.memory_space<vmem>>, %arg6: memref<8x128xf32, #tpu.memory_space<vmem>>) attributes {dimension_semantics = [#tpu.dimension_semantics<parallel>, #tpu.dimension_semantics<parallel>, #tpu.dimension_semantics<arbitrary>], iteration_bounds = array<i64: 1, 1, 1>, scalar_prefetch = 0 : i64, scratch_operands = 0 : i64, tpu.core_type = #tpu.core_type<tc>, window_params = [{transform_indices = @transform_0, window_bounds = array<i64: 8, 32>}, {transform_indices = @transform_1, window_bounds = array<i64: 32, 128>}, {transform_indices = @transform_2, window_bounds = array<i64: 1, 128>}, {transform_indices = @transform_3, window_bounds = array<i64: 8, 128>}]} {
    %c0_i32 = arith.constant 0 : i32
    %0 = arith.cmpi eq, %arg2, %c0_i32 : i32
    %1 = arith.extui %0 : i1 to i32
    %c0_i32_0 = arith.constant 0 : i32
    %2 = arith.cmpi ne, %1, %c0_i32_0 : i32
    scf.if %2 {
      %cst_10 = arith.constant 0.000000e+00 : f32
      %12 = vector.broadcast %cst_10 : f32 to vector<8x128xf32>
      %c0_11 = arith.constant 0 : index
      %c0_12 = arith.constant 0 : index
      %13 = vector.load %arg6[%c0_11, %c0_12] : memref<8x128xf32, #tpu.memory_space<vmem>>, vector<8x128xf32>
      tpu.vector_store %arg6[%c0_11, %c0_12], %12 {strides = array<i32>} : memref<8x128xf32, #tpu.memory_space<vmem>>, vector<8x128xf32>,
    } else {
    }
    %c0 = arith.constant 0 : index
    %c0_1 = arith.constant 0 : index
    %3 = vector.load %arg6[%c0, %c0_1] : memref<8x128xf32, #tpu.memory_space<vmem>>, vector<8x128xf32>
    %c0_2 = arith.constant 0 : index
    %c0_3 = arith.constant 0 : index
    %4 = vector.load %arg3[%c0_2, %c0_3] : memref<8x32xf32, #tpu.memory_space<vmem>>, vector<8x32xf32>
    %c0_4 = arith.constant 0 : index
    %c0_5 = arith.constant 0 : index
    %5 = vector.load %arg4[%c0_4, %c0_5] : memref<32x128xf32, #tpu.memory_space<vmem>>, vector<32x128xf32>
    %cst = arith.constant dense<0.000000e+00> : vector<8x128xf32>
    %6 = tpu.matmul %4, %5, %cst {dimension_numbers = #tpu.dot_dimension_numbers<[1], [0], [0], [1], [0, 0, 1, 1], [], []>} : vector<8x32xf32>, vector<32x128xf32>, vector<8x128xf32> -> vector<8x128xf32>
    %7 = arith.addf %3, %6 : vector<8x128xf32>
    %c0_6 = arith.constant 0 : index
    %c0_7 = arith.constant 0 : index
    %8 = vector.load %arg6[%c0_6, %c0_7] : memref<8x128xf32, #tpu.memory_space<vmem>>, vector<8x128xf32>
    tpu.vector_store %arg6[%c0_6, %c0_7], %7 {strides = array<i32>} : memref<8x128xf32, #tpu.memory_space<vmem>>, vector<8x128xf32>,
    %c0_i32_8 = arith.constant 0 : i32
    %9 = arith.cmpi eq, %arg2, %c0_i32_8 : i32
    %10 = arith.extui %9 : i1 to i32
    %c0_i32_9 = arith.constant 0 : i32
    %11 = arith.cmpi ne, %10, %c0_i32_9 : i32
    scf.if %11 {
      %c0_10 = arith.constant 0 : index
      %c0_11 = arith.constant 0 : index
      %12 = vector.load %arg6[%c0_10, %c0_11] : memref<8x128xf32, #tpu.memory_space<vmem>>, vector<8x128xf32>
      %c0_12 = arith.constant 0 : index
      %c0_13 = arith.constant 0 : index
      %13 = vector.load %arg5[%c0_12, %c0_13] : memref<1x128xf32, #tpu.memory_space<vmem>>, vector<1x128xf32>
      %14 = vector.broadcast %13 : vector<1x128xf32> to vector<8x128xf32>
      %15 = arith.addf %12, %14 : vector<8x128xf32>
      %cst_14 = arith.constant 0.000000e+00 : f32
      %16 = vector.broadcast %cst_14 : f32 to vector<8x128xf32>
      %17 = arith.maximumf %15, %16 : vector<8x128xf32>
      %c0_15 = arith.constant 0 : index
      %c0_16 = arith.constant 0 : index
      %18 = vector.load %arg6[%c0_15, %c0_16] : memref<8x128xf32, #tpu.memory_space<vmem>>, vector<8x128xf32>
      tpu.vector_store %arg6[%c0_15, %c0_16], %17 {strides = array<i32>} : memref<8x128xf32, #tpu.memory_space<vmem>>, vector<8x128xf32>,
    } else {
    }
    return
  }
  func.func @transform_0(%arg0: i32, %arg1: i32, %arg2: i32) -> (i32, i32) {
    %c0_i32 = arith.constant 0 : i32
    return %arg0, %arg2 : i32, i32
  }
  func.func @transform_1(%arg0: i32, %arg1: i32, %arg2: i32) -> (i32, i32) {
    %c0_i32 = arith.constant 0 : i32
    return %arg2, %arg1 : i32, i32
  }
  func.func @transform_2(%arg0: i32, %arg1: i32, %arg2: i32) -> (i32, i32) {
    %c0_i32 = arith.constant 0 : i32
    %c0_i32_0 = arith.constant 0 : i32
    return %c0_i32, %arg1 : i32, i32
  }
  func.func @transform_3(%arg0: i32, %arg1: i32, %arg2: i32) -> (i32, i32) {
    %c0_i32 = arith.constant 0 : i32
    return %arg0, %arg1 : i32, i32
  }
}

</mosaic_0001>

<bundles_post_ra>
// kernel: relu_layer.1
= control target key start
LH: loop header
LB: loop body
LE: loop exit
PB: predicated region body
PF: predicated region fallthrough
CT: control target
= control target key end

     0   :  { %v173_v1 = vmov 0.0   ;;  %vm174_vm0 = vmmov 0   ;;  %s217_s0 = inlined_call_operand.vmem [shape: f32[8,32], index: 0, kind: input, shape index: {}]   ;;  %s218_s1 = inlined_call_operand.vmem [shape: f32[32,128], index: 1, kind: input, shape index: {}]   ;;  %s219_s2 = inlined_call_operand.vmem [shape: f32[1,128], index: 2, kind: input, shape index: {}]   ;;  %s220_s3 = inlined_call_operand.hbm [shape: f32[8,128], index: 3, kind: output, shape index: {}]  }
   0x1   :  { %v25_v0 = vld [vmem:[%s218_s1 + $0x18] sm:$0xff]  ;;  %137 = vmatprep.subr.mxu0 %v173_v1  ;;  %v24_v2 = vld [vmem:[%s218_s1 + $0x10] sm:$0xff]  ;;  %145 = vmatprep.mubr.msk.f32.mxu0 %vm174_vm0, %v173_v1 }
   0x2   :  { %8 = vsyncpa [#allocation3], 0  ;;  %138 = vmatpush3.msra.mxu0 %v25_v0  ;;  %v23_v3 = vld [vmem:[%s218_s1 + $0x8] sm:$0xff]  ;;  %v22_v4 = vld [vmem:[%s218_s1] sm:$0xff]  ;;  %vm26_vm1 = vcmask 261120   ;;  %s175_s24 = smov [#allocation2]  }
   0x3   :  { %139 = vmatprep.subr.mxu0 %v173_v1  ;;  %v21_v5 = vld [vmem:[%s217_s0] sm:$0xff]  ;;  %s122_s25 = sshll.u32 %s175_s24, 4  ;;  %s123_s25 = int_to_ptr.vmem [resolvable:$true] %s122_s25 }
   0x4   :  { %140 = vmatpush3.msra.mxu0 %v24_v2  ;;  %v131_v7 = vld [vmem:[%s219_s2] ss:$0 sm:$0xff]  ;;  %s151_s1 = scalar_lea.vmem %s123_s25, 128  ;;  %p156_p1 = scmp.lt.s32.totalorder %s123_s25, %s123_s25 }
   0x5   :  { %141 = vmatprep.subr.mxu0 %v173_v1  ;;  %p152_p0 = scmp.ne.s32.totalorder %s123_s25, %s151_s1  ;;  %p157_p2 = scmp.lt.s32.totalorder %s151_s1, %s151_s1 }
   0x6   :  { %142 = vmatpush3.msra.mxu0 %v23_v3 }
   0x7   :  { %143 = vmatprep.subr.mxu0 %v173_v1  ;;  %p158_p3 = por %p157_p2, %p156_p1 }
   0x8   :  { %144 = vmatpush3.msra.mxu0 %v22_v4 }
   0x9   :  { %146 = vmatmul.mubr.msk.f32.vlgmr.msra.gmra.mxu0 %vm26_vm1, %v21_v5  ;;  %p159_p4 = pnand %p158_p3, %p152_p0 }
  0xc9   :  { %v96_v6 = vpop.f32.mrf.mxu0 }
  0xca   :  { %v113_v9 = vadd.f32 %v131_v7, %v96_v6 }
  0xcb   :  { %v147_v8 = vpop.f32.mrf.mxu0 }
  0xcc   :  { %v114_v10 = vmax.f32 %v113_v9, 0.0 }
  0xce   :  { %115 = vst [vmem:[#allocation2] sm:$0xff] %v114_v10 }
  0xcf   :  { %162 = shalt.err (!%p159_p4)
}
  0xd0   :  { %125 = dma.vmem_to_hbm [thread:$0]  %s123_s25, 128, %s220_s3, [#allocation3]  }
  0xd1   :  { %171 = dma.done.wait [#allocation3], 128  }
  0xd2   :  { %172 = vsyncadd [#allocation3], 4294967168 }
  0xd3   :  { %129 = vsyncpa [#allocation3], 1 }

</bundles_post_ra>
